<compile_context>
chip_gen: v6e
topology: v6e:2x2x1
jax: 0.10.0
libtpu: 0.0.40
codegen_flags: <defaults>
</compile_context>

<pallas_src>
import functools

import jax
import jax.numpy as jnp
import numpy as np
from jax.experimental import pallas as pl
from jax.experimental.pallas import tpu as pltpu


FILTER_SIZES = (2, 3, 4)
MAX_FS = max(FILTER_SIZES)            # 4 taps; fs = 2 + branch_index
NUM_BRANCHES = len(FILTER_SIZES)

ROWS_TARGET = 2048                    # target matmul-M rows per grid step
VMEM_BUDGET = 12 * 1024 * 1024        # conservative (fits v5e's 16 MiB default)


def _round_up(v, m):
    return (v + m - 1) // m * m


def _cdiv(a, b):
    return -(-a // b)


def _fused_conv_relu_pool_kernel(x_ref, w_ref, b_ref, m_ref, o_ref):
    """One batch-group (grid step).

    x_ref: (m_blk, K)  bf16 im2col rows; row b_local*l_pad + p, lanes
                       [t*D:(t+1)*D] hold emb[b, p+t] (zero past the sequence).
    w_ref: (K, N)      bf16 fused conv weight (zero-padded taps / lanes).
    b_ref: (1, N)      f32  fused bias (zeros in unused lane slots).
    m_ref: (m_blk, N)  f32  validity mask (1.0 valid conv-output row, else 0).
    o_ref: (m_blk, N)  pooled channels-last output.
    """
    # Single full-depth MXU matmul (K = MAX_FS*D), f32 accumulation.
    acc = jnp.dot(x_ref[...], w_ref[...], preferred_element_type=jnp.float32)

    # Bias + ReLU, then zero invalid rows.  Post-ReLU values are >= 0, so the
    # zeroed rows act as -inf padding for the max-pool below.
    r = jnp.maximum(acc + b_ref[...], 0.0) * m_ref[...]

    # MaxPool2d(3, stride=1, padding=1) along the sequence axis (the W dim of
    # the conv output is 1, so pooling there is identity).  Shifts go through
    # the XLU via pltpu.roll; every wrap-around / cross-batch neighbour is an
    # invalid (already-zeroed) row, so no extra boundary handling is needed.
    rows = r.shape[0]
    nxt = pltpu.roll(r, shift=rows - 1, axis=0)    # r[i+1] -> row i
    prv = pltpu.roll(r, shift=1, axis=0)           # r[i-1] -> row i
    o_ref[...] = jnp.maximum(jnp.maximum(r, nxt), prv).astype(o_ref.dtype)


def fused_conv_relu_pool(emb, w_fused_bf16, b_fused, *, num_channels,
                         out_dtype=jnp.float32):
    """emb: (B, L, D) float. Returns (B, l_pad, N) with N = round_up(3*C, 128).

    Branch j (fs = 2 + j) lives in lanes [j*C, (j+1)*C); only rows
    [:, :L - fs + 1, :] are valid pooled conv outputs (the rest are zero).
    """
    B, L, D = emb.shape
    K, N = w_fused_bf16.shape
    assert K == MAX_FS * D
    C = num_channels

    # Rows per batch element: >= max h_out (= L-1) plus at least one masked
    # separator row (so the roll-based pool never sees a neighbouring batch
    # element's valid row), and a multiple of 8 for sublane alignment.
    l_pad = _round_up(L, 8)

    # Batch elements per grid step: big slabs for writeback efficiency, but
    # keep g >= 2 (v7x has 2 TensorCores) and stay inside the VMEM budget.
    out_isize = np.dtype(out_dtype).itemsize
    bytes_per_row = 2 * K * 2 + 2 * N * 4 + 2 * N * out_isize   # x, mask, out
    fixed_bytes = 2 * K * N * 2 + 2 * N * 4                     # weight, bias
    bt_vmem = max(1, int((VMEM_BUDGET - fixed_bytes) // (bytes_per_row * l_pad)))
    bt = min(B, max(1, ROWS_TARGET // l_pad), bt_vmem)
    if B >= 2:
        bt = min(bt, _cdiv(B, 2))        # keep >= 2 grid steps for dual-TC v7x
    g = _cdiv(B, bt)
    bp = g * bt
    m_blk = bt * l_pad

    # im2col: pack the MAX_FS taps along the lane axis (single pad + concat)
    # so the kernel runs one matmul with K = MAX_FS*D.
    xp = jnp.pad(emb.astype(jnp.bfloat16),
                 ((0, bp - B), (0, l_pad + MAX_FS - 1 - L), (0, 0)))
    x = jnp.concatenate([xp[:, t:t + l_pad, :] for t in range(MAX_FS)], axis=-1)
    x = x.reshape(g * m_blk, K)

    # Precomputed validity mask (constant across grid steps; resident in VMEM,
    # fetched once).  Row p of branch j is a valid conv output iff
    # p < h_out(fs=2+j) = L - 1 - j; lanes beyond 3*C are zero padding.
    pos = jax.lax.broadcasted_iota(jnp.int32, (l_pad, N), 0)
    lane = jax.lax.broadcasted_iota(jnp.int32, (l_pad, N), 1)
    branch = jnp.minimum(lane // C, NUM_BRANCHES - 1)
    valid = (lane < NUM_BRANCHES * C) & (pos < (L - 1) - branch)
    mask = jnp.tile(valid.astype(jnp.float32), (bt, 1))          # (m_blk, N)

    flops = 2 * g * m_blk * K * N
    bytes_accessed = (x.size * 2 + w_fused_bf16.size * 2 + b_fused.size * 4
                      + mask.size * 4 + g * m_blk * N * out_isize)

    out = pl.pallas_call(
        _fused_conv_relu_pool_kernel,
        out_shape=jax.ShapeDtypeStruct((g * m_blk, N), out_dtype),
        grid=(g,),
        in_specs=[
            pl.BlockSpec((m_blk, K), lambda i: (i, 0)),
            pl.BlockSpec((K, N), lambda i: (0, 0)),       # resident weight
            pl.BlockSpec((1, N), lambda i: (0, 0)),       # resident bias
            pl.BlockSpec((m_blk, N), lambda i: (0, 0)),   # resident mask
        ],
        out_specs=pl.BlockSpec((m_blk, N), lambda i: (i, 0)),
        compiler_params=pltpu.CompilerParams(
            dimension_semantics=("parallel",),
            vmem_limit_bytes=32 * 1024 * 1024),
        cost_estimate=pl.CostEstimate(flops=flops, transcendentals=0,
                                      bytes_accessed=bytes_accessed),
    )(x, w_fused_bf16, b_fused, mask)
    return out.reshape(bp, l_pad, N)[:B]


class CNNFeedforwardPallas:
    """JAX/Pallas port of CNN_feedforward.__init__ + the implementable forward."""

    FILTER_SIZES = FILTER_SIZES

    def __init__(self, symptom_size, embedding_dim, number_of_classes,
                 embedding_matrix, pool_dtype=jnp.float32):
        del number_of_classes  # unused by the (partly undefined) reference forward
        self.symptom_size = symptom_size            # == conv output channels C
        self.embedding_dim = embedding_dim
        # pool_dtype=jnp.bfloat16 halves the dominant HBM write stream at the
        # cost of output rounding; default f32 keeps strict parity.
        self.pool_dtype = pool_dtype
        # nn.Embedding weight overridden by embedding_matrix in the reference.
        self.embedding_weight = jnp.asarray(embedding_matrix, dtype=jnp.float32)

        # Deterministic Conv2d(1, C, (fs, D)) params (synthetic init), fused
        # into one tightly packed (MAX_FS*D, round_up(3*C, 128)) weight + bias.
        C, D = symptom_size, embedding_dim
        n = _round_up(NUM_BRANCHES * C, 128)
        key = jax.random.PRNGKey(0)
        w_fused = np.zeros((MAX_FS * D, n), np.float32)
        b_fused = np.zeros((1, n), np.float32)
        self.conv_w = {}   # fs -> (fs*D, C) f32 flattened weight (for checking)
        self.conv_b = {}   # fs -> (1, C)    f32 bias
        for j, fs in enumerate(self.FILTER_SIZES):
            key, kw, kb = jax.random.split(key, 3)
            fan_in = 1 * fs * D
            bound = 1.0 / np.sqrt(fan_in)
            w = jax.random.uniform(kw, (C, 1, fs, D), jnp.float32, -bound, bound)
            b = jax.random.uniform(kb, (C,), jnp.float32, -bound, bound)
            w_flat = jnp.transpose(w.reshape(C, fs * D), (1, 0))    # (fs*D, C)
            self.conv_w[fs] = w_flat
            self.conv_b[fs] = b.reshape(1, C)
            w_fused[:fs * D, j * C:(j + 1) * C] = np.asarray(w_flat)
            b_fused[0, j * C:(j + 1) * C] = np.asarray(b)
        self.n_lanes = n
        self.w_fused = jnp.asarray(w_fused, dtype=jnp.bfloat16)     # MXU operand
        self.b_fused = jnp.asarray(b_fused, dtype=jnp.float32)

    def fused_features(self, x):
        """Channels-last fused buffer (B, l_pad, N); branch j in lanes
        [j*C, (j+1)*C), valid rows [:L - (2+j) + 1].  Consumers that can read
        this directly avoid the per-branch slice + NCHW transpose below."""
        x = x.astype(jnp.int32)
        emb = self.embedding_weight[x]              # gather (XLA glue): (B, L, D)
        return fused_conv_relu_pool(emb, self.w_fused, self.b_fused,
                                    num_channels=self.symptom_size,
                                    out_dtype=self.pool_dtype)

    def __call__(self, x):
        # x: (B, L) integer symptom indices.
        B, L = x.shape
        fused = self.fused_features(x)

        # Slice each filter-size branch back out of the fused channels-last
        # output and match PyTorch NCHW (B, C, H_out, 1).
        C = self.symptom_size
        outs = []
        for j, fs in enumerate(self.FILTER_SIZES):
            h_out = L - fs + 1
            blk = fused[:, :h_out, j * C:(j + 1) * C]               # (B, h_out, C)
            outs.append(jnp.transpose(blk, (0, 2, 1))[..., None])   # (B, C, h_out, 1)
        return outs


def _reference(emb, w_flat, bias, fs):
    """Pure-JAX reference of conv(fs, D) + ReLU + maxpool(3,1,1) for checking."""
    B, L, D = emb.shape
    h_out = L - fs + 1
    win = jnp.stack([emb[:, i:i + h_out, :] for i in range(fs)], axis=2)
    win = win.reshape(B, h_out, fs * D)
    s = jnp.einsum("bhk,kc->bhc", win, w_flat) + bias[None]
    r = jnp.maximum(s, 0.0)
    pad = jnp.full((B, 1, r.shape[-1]), -jnp.inf, r.dtype)
    rp = jnp.concatenate([pad, r, pad], axis=1)
    return jnp.maximum(jnp.maximum(rp[:, :-2], rp[:, 1:-1]), rp[:, 2:])


if __name__ == "__main__":
    # Small, module-consistent shapes.
    B, L = 2, 16                 # batch, sequence length of symptom indices
    symptom_size = 8             # also the number of conv output channels
    embedding_dim = 32
    number_of_classes = 4

    key = jax.random.PRNGKey(0)
    k_emb, k_idx = jax.random.split(key)
    embedding_matrix = jax.random.normal(
        k_emb, (symptom_size, embedding_dim), dtype=jnp.float32)
    x = jax.random.randint(k_idx, (B, L), 0, symptom_size, dtype=jnp.int32)

    model = CNNFeedforwardPallas(symptom_size, embedding_dim,
                                 number_of_classes, embedding_matrix)
    outs = model(x)
    outs = jax.block_until_ready(outs)

    # Sanity check against a pure-JAX reference using the same bf16-rounded
    # matmul inputs (the kernel feeds the MXU in bf16, accumulates in f32).
    emb = embedding_matrix[x]
    emb_bf = emb.astype(jnp.bfloat16).astype(jnp.float32)
    for fs, out in zip(CNNFeedforwardPallas.FILTER_SIZES, outs):
        w_bf = model.conv_w[fs].astype(jnp.bfloat16).astype(jnp.float32)
        ref = _reference(emb_bf, w_bf, model.conv_b[fs], fs)
        ref_nchw = jnp.transpose(ref, (0, 2, 1))[..., None]
        assert out.shape == (B, symptom_size, L - fs + 1, 1), out.shape
        np.testing.assert_allclose(np.asarray(out), np.asarray(ref_nchw),
                                   rtol=1e-4, atol=1e-4)

    print("KERNEL_OK")
</pallas_src>

<mosaic_0001>
module attributes {stable_mosaic.version = 11 : i64} {
  func.func @_fused_conv_relu_pool_kernel(%arg0: i32, %arg1: memref<16x128xbf16, #tpu.memory_space<vmem>>, %arg2: memref<128x128xbf16, #tpu.memory_space<vmem>>, %arg3: memref<1x128xf32, #tpu.memory_space<vmem>>, %arg4: memref<16x128xf32, #tpu.memory_space<vmem>>, %arg5: memref<16x128xf32, #tpu.memory_space<vmem>>) attributes {dimension_semantics = [#tpu.dimension_semantics<parallel>], iteration_bounds = array<i64: 2>, scalar_prefetch = 0 : i64, scratch_operands = 0 : i64, tpu.core_type = #tpu.core_type<tc>, window_params = [{transform_indices = @transform_0, window_bounds = array<i64: 16, 128>}, {pipeline_mode = #tpu.pipeline_mode<synchronous>, transform_indices = @transform_1, window_bounds = array<i64: 128, 128>}, {pipeline_mode = #tpu.pipeline_mode<synchronous>, transform_indices = @transform_2, window_bounds = array<i64: 1, 128>}, {pipeline_mode = #tpu.pipeline_mode<synchronous>, transform_indices = @transform_3, window_bounds = array<i64: 16, 128>}, {transform_indices = @transform_4, window_bounds = array<i64: 16, 128>}]} {
    %c0 = arith.constant 0 : index
    %c0_0 = arith.constant 0 : index
    %0 = vector.load %arg1[%c0, %c0_0] : memref<16x128xbf16, #tpu.memory_space<vmem>>, vector<16x128xbf16>
    %c0_1 = arith.constant 0 : index
    %c0_2 = arith.constant 0 : index
    %1 = vector.load %arg2[%c0_1, %c0_2] : memref<128x128xbf16, #tpu.memory_space<vmem>>, vector<128x128xbf16>
    %cst = arith.constant dense<0.000000e+00> : vector<16x128xf32>
    %2 = tpu.matmul %0, %1, %cst {dimension_numbers = #tpu.dot_dimension_numbers<[1], [0], [0], [1], [0, 0, 1, 1], [], []>} : vector<16x128xbf16>, vector<128x128xbf16>, vector<16x128xf32> -> vector<16x128xf32>
    %c0_3 = arith.constant 0 : index
    %c0_4 = arith.constant 0 : index
    %3 = vector.load %arg3[%c0_3, %c0_4] : memref<1x128xf32, #tpu.memory_space<vmem>>, vector<1x128xf32>
    %4 = vector.broadcast %3 : vector<1x128xf32> to vector<16x128xf32>
    %5 = arith.addf %2, %4 : vector<16x128xf32>
    %cst_5 = arith.constant 0.000000e+00 : f32
    %6 = vector.broadcast %cst_5 : f32 to vector<16x128xf32>
    %7 = arith.maximumf %5, %6 : vector<16x128xf32>
    %c0_6 = arith.constant 0 : index
    %c0_7 = arith.constant 0 : index
    %8 = vector.load %arg4[%c0_6, %c0_7] : memref<16x128xf32, #tpu.memory_space<vmem>>, vector<16x128xf32>
    %9 = arith.mulf %7, %8 : vector<16x128xf32>
    %c15_i32 = arith.constant 15 : i32
    %10 = tpu.dynamic_rotate %9 by %c15_i32 dim 0 : vector<16x128xf32>, i32 -> vector<16x128xf32>
    %c1_i32 = arith.constant 1 : i32
    %11 = tpu.dynamic_rotate %9 by %c1_i32 dim 0 : vector<16x128xf32>, i32 -> vector<16x128xf32>
    %12 = arith.maximumf %9, %10 : vector<16x128xf32>
    %13 = arith.maximumf %12, %11 : vector<16x128xf32>
    %c0_8 = arith.constant 0 : index
    %c0_9 = arith.constant 0 : index
    %14 = vector.load %arg5[%c0_8, %c0_9] : memref<16x128xf32, #tpu.memory_space<vmem>>, vector<16x128xf32>
    tpu.vector_store %arg5[%c0_8, %c0_9], %13 {strides = array<i32>} : memref<16x128xf32, #tpu.memory_space<vmem>>, vector<16x128xf32>,
    return
  }
  func.func @transform_0(%arg0: i32) -> (i32, i32) {
    %c0_i32 = arith.constant 0 : i32
    %c0_i32_0 = arith.constant 0 : i32
    return %arg0, %c0_i32 : i32, i32
  }
  func.func @transform_1(%arg0: i32) -> (i32, i32) {
    %c0_i32 = arith.constant 0 : i32
    %c0_i32_0 = arith.constant 0 : i32
    %c0_i32_1 = arith.constant 0 : i32
    return %c0_i32, %c0_i32_0 : i32, i32
  }
  func.func @transform_2(%arg0: i32) -> (i32, i32) {
    %c0_i32 = arith.constant 0 : i32
    %c0_i32_0 = arith.constant 0 : i32
    %c0_i32_1 = arith.constant 0 : i32
    return %c0_i32, %c0_i32_0 : i32, i32
  }
  func.func @transform_3(%arg0: i32) -> (i32, i32) {
    %c0_i32 = arith.constant 0 : i32
    %c0_i32_0 = arith.constant 0 : i32
    %c0_i32_1 = arith.constant 0 : i32
    return %c0_i32, %c0_i32_0 : i32, i32
  }
  func.func @transform_4(%arg0: i32) -> (i32, i32) {
    %c0_i32 = arith.constant 0 : i32
    %c0_i32_0 = arith.constant 0 : i32
    return %arg0, %c0_i32 : i32, i32
  }
}

</mosaic_0001>

<bundles_post_ra>
// kernel: tpu_custom_call.1
= control target key start
LH: loop header
LB: loop body
LE: loop exit
PB: predicated region body
PF: predicated region fallthrough
CT: control target
= control target key end

     0   :  { %9 = vsyncpa [#allocation3], 0  ;;  %s1029_s0 = inlined_call_operand.hbm [shape: bf16[32,128], index: 0, kind: input, shape index: {}]   ;;  %s1030_s1 = inlined_call_operand.hbm [shape: bf16[128,128], index: 1, kind: input, shape index: {}]   ;;  %s1031_s2 = inlined_call_operand.vmem [shape: f32[1,128], index: 2, kind: input, shape index: {}]   ;;  %s1032_s3 = inlined_call_operand.hbm [shape: f32[16,128], index: 3, kind: input, shape index: {}]   ;;  %s1033_s4 = inlined_call_operand.hbm [shape: f32[32,128], index: 4, kind: output, shape index: {}]  }
   0x1   :  { %11 = vsyncpa [#allocation3 + $0x1], 0 }
   0x2   :  { %12 = vsyncpa [#allocation6], 0 }
   0x3   :  { %13 = vsyncpa [#allocation4], 0 }
   0x4   :  { %15 = vsyncpa [#allocation4 + $0x1], 0  ;;  %s828_s15 = smov 0   ;;  %s830_s16 = smov 0  }
   0x5   :  { %s832_s17 = smov 0   ;;  %s834_s18 = smov 0  }
   0x6 LB: > { %s849_s19 = sadd.s32 4294967295, %s789_s18   ;;  %s498_s20 = sadd.s32 4294967294, %s789_s18   ;;  %s789_s18 = sphi %s834_s18, %s1054_s18   ;;  %s785_s17 = sphi %s832_s17, %s1053_s17   ;;  %s781_s16 = sphi %s830_s16, %s1052_s16   ;;  %s777_s15 = sphi %s828_s15, %s1051_s15  }
   0x7   : > { %p41_p0 = scmp.ne.s32.totalorder %s781_s16, %s777_s15  ;;  %p1034_p1 = scmp.eq.s32.totalorder %s849_s19, 0 }
   0x8   : > { %p128_p2 = scmp.eq.s32.totalorder %s849_s19, 1  ;;  %p134_p3 = scmp.eq.s32.totalorder %s498_s20, 1 }
   0x9   : > { %p858_p4 = por %p1034_p1, %p41_p0  ;;  %p499_p5 = scmp.ge.s32.totalorder %s789_s18, 1 }
   0xa   : > { %p863_p6 = por %p134_p3, %p41_p0  ;;  %p141_p7 = scmp.lt.s32.totalorder %s789_s18, 3 }
   0xb   : > { %s1038_s21 = scalar_select %p858_p4, 1, 0 }
   0xc   : > { %s1039_s22 = scalar_select %p863_p6, 1, 0 }
   0xd   : > { %p868_p8 = pnand %p499_p5, %p141_p7  ;;  %s791_s24 = smov [#allocation5]  }
   0xe   : > { %s153_s25 = sshll.u32 %s791_s24, 4  ;;  %s792_s27 = smov [#allocation7]   ;;  %s154_s25 = int_to_ptr.vmem [resolvable:$true] %s153_s25 }
   0xf   : > { %s1040_s23 = scalar_select %p868_p8, 1, 0 }
  0x10   : > { %p569_p9 = pneg %p868_p8  ;;  %s169_s28 = sshll.u32 %s792_s27, 4  ;;  %s170_s28 = int_to_ptr.vmem [resolvable:$true] %s169_s28 }
  0x11   : > { %s652_s29 = scalar_lea.vmem %s154_s25, 1024  ;;  %p660_p5 = scmp.lt.s32.totalorder %s154_s25, %s154_s25 }
  0x12   : > { %p877_p11 = pnand %p569_p9, %p1034_p1  ;;  %p653_p13 = scmp.ne.s32.totalorder %s154_s25, %s652_s29 }
  0x13   : > { %p661_p7 = scmp.lt.s32.totalorder %s652_s29, %s652_s29 }
  0x14   : > { %p643_p12 = pneg %p877_p11 }
  0x15   : > { %p662_p10 = por %p661_p7, %p660_p5 }
  0x16   : > { %p655_p0 = pnand %p653_p13, %p643_p12 }
  0x18   : > { %p656_p3 = pneg %p655_p0 }
  0x1a   : > { %p663_p9 = pnand %p662_p10, %p656_p3 }
  0x1c   : > { %666 = shalt.err (!%p663_p9)
}
  0x1d   : > { %s793_s30 = smov 64   ;;  %s794_s5 = smov 4  }
  0x1e   : > { %572 = dma.hbm_to_vmem [thread:$0]  (!%p877_p11), %s1030_s1, 1024, %s154_s25, [#allocation6], %s793_s30, %s793_s30, %s794_s5  }
  0x1f   : > { %s678_s8 = scalar_lea.vmem %s170_s28, 256  ;;  %p686_p10 = scmp.lt.s32.totalorder %s170_s28, %s170_s28 }
  0x20   : > { %p679_p13 = scmp.ne.s32.totalorder %s170_s28, %s678_s8  ;;  %p687_p3 = scmp.lt.s32.totalorder %s678_s8, %s678_s8 }
  0x22   : > { %p681_p0 = pnand %p679_p13, %p643_p12  ;;  %p688_p7 = por %p687_p3, %p686_p10 }
  0x24   : > { %p682_p5 = pneg %p681_p0 }
  0x26   : > { %p689_p9 = pnand %p688_p7, %p682_p5 }
  0x28   : > { %692 = shalt.err (!%p689_p9)
}
  0x29   : > { %s795_s9 = smov 128   ;;  %s796_s10 = smov 8  }
  0x2a   : > { %575 = dma.hbm_to_vmem [thread:$0]  (!%p877_p11), %s1032_s3, 256, %s170_s28, [#allocation6], %s795_s9, %s795_s9, %s796_s10  }
  0x2b   : > { %s903_s13 = sadd.s32 1, %s789_s18   ;;  %s28_s20 = sadd.s32 1, %s785_s17 }
  0x2c   : > { %s25_s14 = ssub.s32 %s789_s18, %s903_s13  ;;  %p35_p13 = scmp.ne.s32.totalorder %s785_s17, %s781_s16 }
  0x2d   : > { %p26_p12 = scmp.eq.s32.totalorder %s25_s14, 0  ;;  %p36_p0 = scmp.eq.s32.totalorder %s789_s18, 0 }
  0x2e   : > { %p916_p10 = por %p128_p2, %p35_p13  ;;  %p586_p3 = scmp.lt.s32.totalorder %s789_s18, 2 }
  0x2f   : > { %s912_s24 = scalar_select %p26_p12, %s785_s17, %s28_s20  }
  0x30   : > { %p37_p5 = por %p36_p0, %p35_p13  ;;  %s183_s26 = sand.u32 1, %s785_s17  }
  0x31   : > { %s1042_s25 = scalar_select %p916_p10, 1, 0 }
  0x32   : > { %s503_s27 = sshll.u32 %s183_s26, 3  ;;  %s526_s28 = sshll.u32 %s789_s18, 7 }
  0x33   : > { %s926_s7 = scalar_lea.hbm %s1029_s0, %s526_s28  ;;  %s187_s8 = scalar_lea.vmem [#allocation2], %s503_s27 }
  0x34   : > { %s194_s9 = sshll.u32 %s187_s8, 4  ;;  %p930_p2 = pnand %p586_p3, %p37_p5  ;;  %s928_s9 = int_to_ptr.vmem [resolvable:$true] %s194_s9 }
  0x35   : > { %s934_s11 = scalar_lea.sflag [#allocation3], %s183_s26  ;;  %s693_s12 = scalar_lea.hbm %s926_s7, 128 }
  0x36   : > { %p694_p11 = scmp.ne.s32.totalorder %s926_s7, %s693_s12  ;;  %p695_p7 = pneg %p930_p2 }
  0x37   : > { %s698_s27 = scalar_lea.hbm %s1029_s0, 256  ;;  %p699_p13 = scmp.lt.s32.totalorder %s926_s7, %s1029_s0 }
  0x38   : > { %p696_p9 = pnand %p695_p7, %p694_p11  ;;  %p700_p0 = scmp.lt.s32.totalorder %s698_s27, %s693_s12 }
  0x3a   : > { %p697_p12 = pneg %p696_p9  ;;  %p701_p5 = por %p700_p0, %p699_p13 }
  0x3c   : > { %p702_p3 = pnand %p701_p5, %p697_p12 }
  0x3e   : > { %705 = shalt.err (!%p702_p3)
}
  0x3f   : > { %s706_s26 = scalar_lea.vmem %s928_s9, 128  ;;  %s797_s6 = smov [#allocation2]  }
  0x40   : > { %p707_p1 = scmp.ne.s32.totalorder %s928_s9, %s706_s26  ;;  %s711_s8 = sshll.u32 %s797_s6, 4  ;;  %s712_s8 = int_to_ptr.vmem [resolvable:$false] %s711_s8 }
  0x41   : > { %s713_s14 = scalar_lea.vmem %s712_s8, 256  ;;  %p714_p9 = scmp.lt.s32.totalorder %s928_s9, %s712_s8 }
  0x42   : > { %p709_p6 = pnand %p707_p1, %p695_p7  ;;  %p715_p10 = scmp.lt.s32.totalorder %s713_s14, %s706_s26 }
  0x44   : > { %p710_p11 = pneg %p709_p6  ;;  %p716_p4 = por %p715_p10, %p714_p9 }
  0x46   : > { %p717_p8 = pnand %p716_p4, %p710_p11 }
  0x48   : > { %720 = shalt.err (!%p717_p8)
}
  0x49   : > { %579 = dma.hbm_to_vmem [thread:$0]  (!%p930_p2), %s926_s7, 128, %s928_s9, %s934_s11, %s793_s30, %s793_s30, %s794_s5  }
  0x4a   : > { %p1044_p1 = scmp.ne.s32.totalorder %s1040_s23, 0 }
  0x4b   : > { %s961_s12 = sand.u32 (!%p1044_p1), 1, %s781_s16   ;;  %p1045_p4 = scmp.ne.s32.totalorder (!%p1044_p1), %s1038_s21, 0 }
  0x4c   : > { %206 = sbr.rel (%p1044_p1) target bundleno = 342 (0x156), region = 36  ;;  %s507_s20 = sshll.u32 (!%p1044_p1), %s961_s12, 3 }
  0x4d   : > { %s209_s27 = scalar_lea.sflag (!%p1044_p1), [#allocation3], %s961_s12  ;;  %s965_s28 = scalar_lea.vmem (!%p1044_p1), [#allocation2], %s507_s20 }
  0x51   : > { %764 = dma.done.wait (%p1045_p4), %s209_s27, 128  }
  0x52   : > { %766 = vsyncadd (%p1045_p4), %s209_s27, 4294967168  ;;  %p1046_p6 = scmp.eq.s32.totalorder %s849_s19, 0 }
  0x54   : > { %768 = dma.done.wait (%p1046_p6), [#allocation6], 1280   ;;  %p1047_p8 = pmov %p1046_p6 }
  0x55   : > { %v798_v0 = vmov 0.0   ;;  %vm799_vm0 = vmmov 0   ;;  %v632_v1 = vld [vmem:[#allocation5 + $0x38] sm:$0xff]   ;;  %v633_v2 = vld [vmem:[#allocation5 + $0x30] sm:$0xff]   ;;  %v634_v3 = vld [vmem:[#allocation5 + $0x28] sm:$0xff]   ;;  %v376_v14 = vlaneseq  ;;  %s510_s30 = sshll.u32 %s961_s12, 4 }
  0x56   : > { %770 = vsyncadd (%p1047_p8), [#allocation6], 4294966016  ;;  %537 = vmatprep.subr.bf16.mxu0 %v798_v0  ;;  %553 = vmatprep.mubr.msk.bf16.mxu0 %vm799_vm0, %v798_v0  ;;  %v635_v4 = vld [vmem:[#allocation5 + $0x20] sm:$0xff]   ;;  %v636_v5 = vld [vmem:[#allocation5 + $0x18] sm:$0xff]   ;;  %s527_s5 = sshll.u32 %s849_s19, 8  ;;  %s244_s7 = scalar_lea.vmem [#allocation8], %s510_s30 }
  0x57   : > { %538 = vmatpush3.bf16.msra.mxu0 %v632_v1  ;;  %v637_v6 = vld [vmem:[#allocation5 + $0x10] sm:$0xff]   ;;  %v638_v7 = vld [vmem:[#allocation5 + $0x8] sm:$0xff]   ;;  %v639_v8 = vld [vmem:[#allocation5] sm:$0xff]   ;;  %v377_v20 = vshrl.u32 %v376_v14, 7  ;;  %s406_s9 = sshll.u32 %s244_s7, 4  ;;  %s984_s29 = scalar_lea.hbm %s1033_s4, %s527_s5  ;;  %s986_s9 = int_to_ptr.vmem [resolvable:$true] %s406_s9 }
  0x58   : > { %539 = vmatprep.subr.bf16.mxu0 %v798_v0  ;;  %v640_v9 = vld [vmem:[%s965_s28] sm:$0xff]   ;;  %v370_v16 = vld [vmem:[#allocation7] sm:$0xff]  ;;  %v371_v19 = vld [vmem:[#allocation7 + $0x8] sm:$0xff]  ;;  %s393_s19 = scalar_lea.sflag [#allocation4], %s961_s12  ;;  %s721_s26 = scalar_lea.vmem %s986_s9, 256 }
  0x59   : > { %v511_v10 = vld [vmem:[%s1031_s2] ss:$0 sm:$0xff]  ;;  %vm378_vm1 = vcmp.lt.s32.totalorder %v377_v20, 7  ;;  %vm383_vm2 = vcmp.lt.s32.totalorder %v377_v20, 1  ;;  %p722_p10 = scmp.ne.s32.totalorder %s986_s9, %s721_s26  ;;  %p1048_p2 = scmp.ne.s32.totalorder %s1042_s25, 0 }
  0x5a   : > { %s800_s6 = smov [#allocation8]  }
  0x5b   : > { %540 = vmatpush3.bf16.msra.mxu0 %v633_v2  ;;  %p723_p7 = pnand %p722_p10, %p1048_p2  ;;  %s725_s8 = sshll.u32 %s800_s6, 4  ;;  %s726_s8 = int_to_ptr.vmem [resolvable:$false] %s725_s8 }
  0x5c   : > { %541 = vmatprep.subr.bf16.mxu0 %v798_v0  ;;  %s727_s14 = scalar_lea.vmem %s726_s8, 512  ;;  %p728_p13 = scmp.lt.s32.totalorder %s986_s9, %s726_s8 }
  0x5d   : > { %p724_p12 = pneg %p723_p7  ;;  %p729_p0 = scmp.lt.s32.totalorder %s727_s14, %s721_s26 }
  0x5f   : > { %542 = vmatpush3.bf16.msra.mxu0 %v634_v3  ;;  %p730_p5 = por %p729_p0, %p728_p13 }
  0x60   : > { %543 = vmatprep.subr.bf16.mxu0 %v798_v0 }
  0x61   : > { %p731_p3 = pnand %p730_p5, %p724_p12 }
  0x63   : > { %544 = vmatpush3.bf16.msra.mxu0 %v635_v4 }
  0x64   : > { %545 = vmatprep.subr.bf16.mxu0 %v798_v0 }
  0x67   : > { %546 = vmatpush3.bf16.msra.mxu0 %v636_v5 }
  0x68   : > { %547 = vmatprep.subr.bf16.mxu0 %v798_v0 }
  0x6b   : > { %548 = vmatpush3.bf16.msra.mxu0 %v637_v6 }
  0x6c   : > { %549 = vmatprep.subr.bf16.mxu0 %v798_v0 }
  0x6f   : > { %550 = vmatpush3.bf16.msra.mxu0 %v638_v7 }
  0x70   : > { %551 = vmatprep.subr.bf16.mxu0 %v798_v0 }
  0x73   : > { %552 = vmatpush3.bf16.msra.mxu0 %v639_v8 }
  0x76   : > { %554 = vmatmul.mubr.bf16.vlgmr.msra.gmra.mxu0 %v640_v9 }
 0x136   : > { %v361_v11 = vpop.f32.mrf.mxu0 }
 0x137   : > { %v362_v12 = vadd.f32 %v511_v10, %v361_v11 }
 0x138   : > { %v555_v13 = vpop.f32.mrf.mxu0 }
 0x139   : > { %v368_v15 = vmax.f32 %v362_v12, 0.0 }
 0x13a   : > { %v364_v17 = vpop.f32.mrf.mxu0 }
 0x13b   : > { %v365_v18 = vadd.f32 %v511_v10, %v364_v17  ;;  %v372_v22 = vmul.f32 %v370_v16, %v368_v15 }
 0x13c   : > { %v556_v21 = vpop.f32.mrf.mxu0 }
 0x13d   : > { %v369_v23 = vmax.f32 %v365_v18, 0.0  ;;  %v374_v25 = vrot.slane %v372_v22, 1  ;;  %v381_v28 = vrot.slane %v372_v22, 7 }
 0x13f   : > { %v373_v24 = vmul.f32 %v371_v19, %v369_v23 }
 0x141   : > { %v375_v26 = vrot.slane %v373_v24, 1  ;;  %v382_v27 = vrot.slane %v373_v24, 7 }
 0x143   : > { %v379_v29 = vsel %vm378_vm1, %v374_v25, %v375_v26  ;;  %v380_v30 = vsel %vm378_vm1, %v375_v26, %v374_v25  ;;  %v384_v33 = vsel %vm383_vm2, %v381_v28, %v382_v27  ;;  %v385_v34 = vsel %vm383_vm2, %v382_v27, %v381_v28 }
 0x144   : > { %v386_v31 = vmax.f32 %v372_v22, %v379_v29  ;;  %v387_v32 = vmax.f32 %v373_v24, %v380_v30 }
 0x146   : > { %v388_v35 = vmax.f32 %v386_v31, %v385_v34  ;;  %v389_v36 = vmax.f32 %v387_v32, %v384_v33 }
 0x148   : > { %391 = vst [vmem:[%s244_s7 + $0x8] sm:$0xff] %v389_v36  ;;  %390 = vst [vmem:[%s244_s7] sm:$0xff] %v388_v35 }
 0x149   : > { %734 = shalt.err (!%p731_p3)
}
 0x14a   : > { %s735_s20 = scalar_lea.hbm %s984_s29, 256  ;;  %s739_s21 = scalar_lea.hbm %s1033_s4, 512 }
 0x14b   : > { %p736_p11 = scmp.ne.s32.totalorder %s984_s29, %s735_s20  ;;  %p740_p4 = scmp.lt.s32.totalorder %s984_s29, %s1033_s4 }
 0x14c   : > { %p741_p6 = scmp.lt.s32.totalorder %s739_s21, %s735_s20 }
 0x14d   : > { %p737_p9 = pnand %p736_p11, %p1048_p2 }
 0x14e   : > { %p742_p8 = por %p741_p6, %p740_p4 }
 0x14f   : > { %p738_p1 = pneg %p737_p9 }
 0x151   : > { %p743_p10 = pnand %p742_p8, %p738_p1 }
 0x153   : > { %746 = shalt.err (!%p743_p10)
}
 0x154   : > { %s801_s5 = smov 128   ;;  %s802_s7 = smov 8  }
 0x155   : > { %567 = dma.vmem_to_hbm [thread:$0]  (%p1048_p2), %s986_s9, 256, %s984_s29, %s393_s19, %s801_s5, %s801_s5, %s802_s7  }
 0x156 PF: > { %s421_s10 = sand.u32 1, %s777_s15   ;;  %p1049_p7 = scmp.ne.s32.totalorder %s1039_s22, 0 }
 0x157   : > { %p1050_p12 = scmp.ge.s32.totalorder %s789_s18, 2  ;;  %s422_s11 = scalar_lea.sflag [#allocation4], %s421_s10 }
 0x159   : > { %p581_p13 = pnand %p1050_p12, %p1049_p7 }
 0x15b   : > { %p582_p0 = pneg %p581_p13 }
 0x15d   : > { %772 = dma.done.wait (%p582_p0), %s422_s11, 256  }
 0x15e   : > { %774 = vsyncadd (%p582_p0), %s422_s11, 4294967040  ;;  %p18_p5 = scmp.ge.s32.totalorder %s903_s13, 4   ;;  %s1051_s15 = smov %s781_s16 }
 0x15f   : > { %s1052_s16 = smov %s785_s17  ;;  %s1053_s17 = smov %s912_s24 }
 0x160   : > { %s1054_s18 = smov %s903_s13  ;;  %20 = sbr.rel (!%p18_p5) target bundleno = 6 (0x6), region = 89 }
 0x165   :  { %427 = vsyncpa [#allocation3], 1 }
 0x166   :  { %429 = vsyncpa [#allocation3 + $0x1], 1 }
 0x167   :  { %430 = vsyncpa [#allocation6], 1 }
 0x168   :  { %431 = vsyncpa [#allocation4], 1 }
 0x169   :  { %433 = vsyncpa [#allocation4 + $0x1], 1 }

</bundles_post_ra>
